<compile_context>
chip_gen: v7x
topology: tpu7x:2x2x1
jax: 0.10.0
libtpu: 0.0.40
codegen_flags: <defaults>
</compile_context>

<pallas_src>
import functools

import jax
import jax.numpy as jnp
from jax.experimental import pallas as pl
from jax.experimental.pallas import tpu as pltpu


def _round_up(x, m):
    return ((x + m - 1) // m) * m


@functools.lru_cache(maxsize=1)
def _vmem_budget_bytes():
    """Generation-aware (tile_budget, scoped_vmem_limit) in bytes."""
    try:
        cap = int(pltpu.get_tpu_info().vmem_capacity_bytes)
    except Exception:
        cap = 64 << 20  # conservative per-core fallback (v7x-sized)
    cap = max(cap, 32 << 20)
    tile_budget = int(cap * 0.40)                 # pipeline tile buffers only
    vmem_limit = min(int(cap * 0.75), 112 << 20)  # leave headroom for Mosaic scratch
    return tile_budget, vmem_limit


def _choose_tiles(M, E, F, q_bytes, w_bytes, io_bytes, tile_budget):
    """Pick (tm, tf): row tile and feature tile, budgeted against VMEM.

    Budget model is padding-aware: the (tm, E) ques block is lane-padded to
    ceil(E/128)*128, the (E, tf) weight block is sublane-padded to ceil(E/8)*8,
    the (1, tf) bias block to 8 sublanes; every block is counted as
    double-buffered by the auto-pipeline.
    """
    # Candidate feature tiles: full F first, then lane-dense divisors of F.
    tf_cands = [F]
    if F % 128 == 0:
        for tf in (2048, 1024, 512, 256, 128):
            if tf < F and F % tf == 0:
                tf_cands.append(tf)

    E_lane = _round_up(E, 128)   # ques block lane padding
    E_sub = _round_up(E, 8)      # weight block sublane padding
    m_pad8 = _round_up(max(M, 1), 8)

    for tf in tf_cands:
        # Weight + bias blocks (double-buffered by the pipeline).
        resident = 2 * (E_sub * tf * w_bytes + 8 * tf * w_bytes)
        # Double-buffered ques / img / out row blocks.
        per_row = 2 * (E_lane * q_bytes + 2 * tf * io_bytes)
        avail = tile_budget - resident
        if avail <= 0:
            continue
        tm_cap = int(avail // per_row)
        if tm_cap < 8:
            continue
        tm = min(2048, tm_cap)
        tm = (tm // 8) * 8                 # 8-sublane alignment is all we need
        tm = max(8, min(tm, m_pad8))
        # Only force a >=2-step row split when both halves are >= 256 rows:
        # worthwhile for megacore row-sharding (v7x), pure per-step overhead on
        # single-TC chips / small inference shapes.
        if tm >= m_pad8 and m_pad8 >= 512:
            tm = max(256, _round_up((m_pad8 + 1) // 2, 8))
        return tm, tf

    # Fallback (huge E*F): minimal row tile, smallest lane-dense feature tile.
    # May still exceed the scoped limit for pathological shapes -> compile error,
    # never silent wrong results.
    return 8, tf_cands[-1]


def _v_filter_kernel(ques_ref, w_ref, b_ref, img_ref, out_ref):
    # ques_ref: (TM, E)   w_ref: (E, TF)   b_ref: (1, TF)   img_ref/out_ref: (TM, TF)
    logits = jnp.dot(ques_ref[...].astype(jnp.float32),
                     w_ref[...].astype(jnp.float32),
                     preferred_element_type=jnp.float32)
    gate = jax.nn.sigmoid(logits + b_ref[...].astype(jnp.float32))
    out_ref[...] = (img_ref[...].astype(jnp.float32) * gate).astype(out_ref.dtype)


@jax.jit
def v_filter(img, ques, weight_t, bias):
    """img: (B, R, F), ques: (B, R, E), weight_t: (E, F), bias: (F,)."""
    B, R, F = img.shape
    E = ques.shape[-1]
    M = B * R

    tile_budget, vmem_limit = _vmem_budget_bytes()
    tm, tf = _choose_tiles(
        M, E, F,
        jnp.dtype(ques.dtype).itemsize,
        jnp.dtype(weight_t.dtype).itemsize,
        jnp.dtype(img.dtype).itemsize,
        tile_budget,
    )
    grid_m = pl.cdiv(M, tm)      # ragged last row-block handled by Pallas masking
    grid_f = F // tf             # tf == F when F is not a multiple of 128

    ques2d = ques.reshape(M, E)   # row-major reshape: free
    img2d = img.reshape(M, F)
    bias2d = bias.reshape(1, F)

    out2d = pl.pallas_call(
        _v_filter_kernel,
        out_shape=jax.ShapeDtypeStruct((M, F), img.dtype),
        grid_spec=pltpu.PrefetchScalarGridSpec(
            num_scalar_prefetch=0,
            # Feature tile OUTER, rows INNER: weight/bias block indices are
            # constant across the inner axis -> their DMA is skipped between
            # consecutive steps (truly resident per feature tile).
            grid=(grid_f, grid_m),
            in_specs=[
                pl.BlockSpec((tm, E), lambda j, i: (i, 0)),   # ques rows
                pl.BlockSpec((E, tf), lambda j, i: (0, j)),   # weight tile (resident)
                pl.BlockSpec((1, tf), lambda j, i: (0, j)),   # bias tile (resident)
                pl.BlockSpec((tm, tf), lambda j, i: (i, j)),  # img rows
            ],
            out_specs=pl.BlockSpec((tm, tf), lambda j, i: (i, j)),
        ),
        compiler_params=pltpu.CompilerParams(
            dimension_semantics=("parallel", "parallel"),
            vmem_limit_bytes=vmem_limit,
        ),
    )(ques2d, weight_t, bias2d, img2d)

    return out2d.reshape(B, R, F)


def _kaiming_uniform(key, out_features, in_features, dtype=jnp.float32):
    # nn.init.kaiming_uniform_ defaults: a=0, fan_in, leaky_relu gain = sqrt(2)
    gain = jnp.sqrt(2.0)
    bound = gain * jnp.sqrt(3.0 / in_features)
    return jax.random.uniform(key, (out_features, in_features), dtype,
                              minval=-bound, maxval=bound)


def _reference(img, ques, weight_t, bias):
    gate = jax.nn.sigmoid(ques @ weight_t + bias)
    return img * gate


if __name__ == "__main__":
    word_embedding_size = 32     # hparams.word_embedding_size
    img_feature_size = 128       # hparams.img_feature_size

    key = jax.random.PRNGKey(0)
    k_w, k_q, k_i, k_q2, k_i2 = jax.random.split(key, 5)

    # Deterministic parameter init (mirrors kaiming_uniform_ + zero bias).
    weight = _kaiming_uniform(k_w, img_feature_size, word_embedding_size)  # (F, E) PyTorch layout
    weight_t = weight.T                                                    # (E, F) kernel layout
    bias = jnp.zeros((img_feature_size,), jnp.float32)

    # Case 1: divisible row count.
    batch, num_rounds = 2, 8
    ques = jax.random.normal(k_q, (batch, num_rounds, word_embedding_size), jnp.float32)
    img = jax.random.normal(k_i, (batch, num_rounds, img_feature_size), jnp.float32)
    out = jax.block_until_ready(v_filter(img, ques, weight_t, bias))
    ref = _reference(img, ques, weight_t, bias)
    assert out.shape == img.shape
    assert jnp.allclose(out, ref, atol=1e-5, rtol=1e-5), "mismatch vs JAX reference (case 1)"

    # Case 2: row count not divisible by 8 / tile (exercises the ragged cdiv
    # boundary block -- no host-side pad or slice any more).
    batch2, num_rounds2 = 3, 5
    ques2 = jax.random.normal(k_q2, (batch2, num_rounds2, word_embedding_size), jnp.float32)
    img2 = jax.random.normal(k_i2, (batch2, num_rounds2, img_feature_size), jnp.float32)
    out2 = jax.block_until_ready(v_filter(img2, ques2, weight_t, bias))
    ref2 = _reference(img2, ques2, weight_t, bias)
    assert out2.shape == img2.shape
    assert jnp.allclose(out2, ref2, atol=1e-5, rtol=1e-5), "mismatch vs JAX reference (case 2)"

    # Case 3: bf16 I/O (recommended for production: halves the dominant
    # img-read + out-write HBM traffic; kernel computes in f32 internally).
    img_bf = img.astype(jnp.bfloat16)
    ques_bf = ques.astype(jnp.bfloat16)
    w_bf = weight_t.astype(jnp.bfloat16)
    b_bf = bias.astype(jnp.bfloat16)
    out_bf = jax.block_until_ready(v_filter(img_bf, ques_bf, w_bf, b_bf))
    ref_bf = _reference(img_bf.astype(jnp.float32), ques_bf.astype(jnp.float32),
                        w_bf.astype(jnp.float32), b_bf.astype(jnp.float32))
    assert out_bf.dtype == jnp.bfloat16
    assert jnp.allclose(out_bf.astype(jnp.float32), ref_bf, atol=3e-2, rtol=3e-2), \
        "mismatch vs JAX reference (case 3, bf16)"

    print("KERNEL_OK")
</pallas_src>

<mosaic_0001>
module attributes {stable_mosaic.version = 11 : i64} {
  func.func @_v_filter_kernel(%arg0: i32, %arg1: i32, %arg2: memref<16x32xf32, #tpu.memory_space<vmem>>, %arg3: memref<32x128xf32, #tpu.memory_space<vmem>>, %arg4: memref<1x128xf32, #tpu.memory_space<vmem>>, %arg5: memref<16x128xf32, #tpu.memory_space<vmem>>, %arg6: memref<16x128xf32, #tpu.memory_space<vmem>>) attributes {dimension_semantics = [#tpu.dimension_semantics<parallel>, #tpu.dimension_semantics<parallel>], iteration_bounds = array<i64: 1, 1>, scalar_prefetch = 0 : i64, scratch_operands = 0 : i64, tpu.core_type = #tpu.core_type<tc>, window_params = [{transform_indices = @transform_0, window_bounds = array<i64: 16, 32>}, {transform_indices = @transform_1, window_bounds = array<i64: 32, 128>}, {transform_indices = @transform_2, window_bounds = array<i64: 1, 128>}, {transform_indices = @transform_3, window_bounds = array<i64: 16, 128>}, {transform_indices = @transform_4, window_bounds = array<i64: 16, 128>}]} {
    %c0 = arith.constant 0 : index
    %c0_0 = arith.constant 0 : index
    %0 = vector.load %arg2[%c0, %c0_0] : memref<16x32xf32, #tpu.memory_space<vmem>>, vector<16x32xf32>
    %c0_1 = arith.constant 0 : index
    %c0_2 = arith.constant 0 : index
    %1 = vector.load %arg3[%c0_1, %c0_2] : memref<32x128xf32, #tpu.memory_space<vmem>>, vector<32x128xf32>
    %cst = arith.constant dense<0.000000e+00> : vector<16x128xf32>
    %2 = tpu.matmul %0, %1, %cst {dimension_numbers = #tpu.dot_dimension_numbers<[1], [0], [0], [1], [0, 0, 1, 1], [], []>} : vector<16x32xf32>, vector<32x128xf32>, vector<16x128xf32> -> vector<16x128xf32>
    %c0_3 = arith.constant 0 : index
    %c0_4 = arith.constant 0 : index
    %3 = vector.load %arg4[%c0_3, %c0_4] : memref<1x128xf32, #tpu.memory_space<vmem>>, vector<1x128xf32>
    %4 = vector.broadcast %3 : vector<1x128xf32> to vector<16x128xf32>
    %5 = arith.addf %2, %4 : vector<16x128xf32>
    %6 = arith.negf %5 : vector<16x128xf32>
    %7 = math.exp %6 : vector<16x128xf32>
    %cst_5 = arith.constant 1.000000e+00 : f32
    %8 = vector.broadcast %cst_5 : f32 to vector<16x128xf32>
    %9 = arith.addf %8, %7 : vector<16x128xf32>
    %10 = arith.divf %8, %9 : vector<16x128xf32>
    %c0_6 = arith.constant 0 : index
    %c0_7 = arith.constant 0 : index
    %11 = vector.load %arg5[%c0_6, %c0_7] : memref<16x128xf32, #tpu.memory_space<vmem>>, vector<16x128xf32>
    %12 = arith.mulf %11, %10 : vector<16x128xf32>
    %c0_8 = arith.constant 0 : index
    %c0_9 = arith.constant 0 : index
    %13 = vector.load %arg6[%c0_8, %c0_9] : memref<16x128xf32, #tpu.memory_space<vmem>>, vector<16x128xf32>
    tpu.vector_store %arg6[%c0_8, %c0_9], %12 {strides = array<i32>} : memref<16x128xf32, #tpu.memory_space<vmem>>, vector<16x128xf32>,
    return
  }
  func.func @transform_0(%arg0: i32, %arg1: i32) -> (i32, i32) {
    %c0_i32 = arith.constant 0 : i32
    %c0_i32_0 = arith.constant 0 : i32
    return %arg1, %c0_i32 : i32, i32
  }
  func.func @transform_1(%arg0: i32, %arg1: i32) -> (i32, i32) {
    %c0_i32 = arith.constant 0 : i32
    %c0_i32_0 = arith.constant 0 : i32
    return %c0_i32, %arg0 : i32, i32
  }
  func.func @transform_2(%arg0: i32, %arg1: i32) -> (i32, i32) {
    %c0_i32 = arith.constant 0 : i32
    %c0_i32_0 = arith.constant 0 : i32
    return %c0_i32, %arg0 : i32, i32
  }
  func.func @transform_3(%arg0: i32, %arg1: i32) -> (i32, i32) {
    %c0_i32 = arith.constant 0 : i32
    return %arg1, %arg0 : i32, i32
  }
  func.func @transform_4(%arg0: i32, %arg1: i32) -> (i32, i32) {
    %c0_i32 = arith.constant 0 : i32
    return %arg1, %arg0 : i32, i32
  }
}

</mosaic_0001>

<bundles_post_ra>
// kernel: v_filter.1
= control target key start
LH: loop header
LB: loop body
LE: loop exit
PB: predicated region body
PF: predicated region fallthrough
CT: control target
= control target key end

     0   :  { %9 = vsyncpa [#allocation3], 0  ;;  %s429_s0 = inlined_call_operand.hbm [shape: f32[16,32], index: 0, kind: input, shape index: {}]   ;;  %s430_s1 = inlined_call_operand.hbm [shape: f32[32,128], index: 1, kind: input, shape index: {}]   ;;  %s431_s2 = inlined_call_operand.vmem [shape: f32[1,128], index: 2, kind: input, shape index: {}]   ;;  %s432_s3 = inlined_call_operand.hbm [shape: f32[16,128], index: 3, kind: input, shape index: {}]   ;;  %s433_s4 = inlined_call_operand.hbm [shape: f32[16,128], index: 4, kind: output, shape index: {}]  }
   0x1   :  { %10 = vsyncpa [#allocation6], 0 }
   0x2   :  { %11 = vsyncpa [#allocation4], 0  ;;  %s328_s15 = smov [#allocation5]   ;;  %s329_s17 = smov [#allocation2]  }
   0x3   :  { %s29_s16 = sshll.u32 %s328_s15, 4  ;;  %s17_s18 = sshll.u32 %s329_s17, 4  ;;  %s30_s16 = int_to_ptr.vmem [resolvable:$true] %s29_s16  ;;  %s359_s18 = int_to_ptr.vmem [resolvable:$true] %s17_s18 }
   0x4   :  { %s234_s21 = scalar_lea.hbm %s430_s1, 512 }
   0x5   :  { %p235_p0 = scmp.ne.s32.totalorder %s430_s1, %s234_s21  ;;  %p238_p1 = scmp.lt.u32.totalorder %s234_s21, %s430_s1 }
   0x7   :  { %p240_p2 = pnand %p238_p1, %p235_p0 }
   0x9   :  { %243 = shalt.err (!%p240_p2)
}
   0xa   :  { %s244_s26 = scalar_lea.vmem %s30_s16, 512  ;;  %p249_p4 = scmp.lt.s32.totalorder %s30_s16, %s30_s16 }
   0xb   :  { %p245_p3 = scmp.ne.s32.totalorder %s30_s16, %s244_s26  ;;  %p250_p5 = scmp.lt.s32.totalorder %s244_s26, %s244_s26 }
   0xd   :  { %p251_p6 = por %p250_p5, %p249_p4 }
   0xf   :  { %p252_p7 = pnand %p251_p6, %p245_p3 }
  0x11   :  { %255 = shalt.err (!%p252_p7)
}
  0x12   :  { %s330_s27 = smov 128   ;;  %s331_s28 = smov 8  }
  0x13   :  { %35 = dma.hbm_to_vmem [thread:$0]  %s430_s1, 512, %s30_s16, [#allocation6], %s330_s27, %s330_s27, %s331_s28  }
  0x14   :  { %s256_s7 = scalar_lea.hbm %s429_s0, 256 }
  0x15   :  { %p257_p8 = scmp.ne.s32.totalorder %s429_s0, %s256_s7  ;;  %p260_p9 = scmp.lt.u32.totalorder %s256_s7, %s429_s0 }
  0x17   :  { %p262_p10 = pnand %p260_p9, %p257_p8 }
  0x19   :  { %265 = shalt.err (!%p262_p10)
}
  0x1a   :  { %s266_s12 = scalar_lea.vmem %s359_s18, 256  ;;  %p271_p12 = scmp.lt.s32.totalorder %s359_s18, %s359_s18 }
  0x1b   :  { %p267_p11 = scmp.ne.s32.totalorder %s359_s18, %s266_s12  ;;  %p272_p13 = scmp.lt.s32.totalorder %s266_s12, %s266_s12 }
  0x1d   :  { %p273_p0 = por %p272_p13, %p271_p12 }
  0x1f   :  { %p274_p1 = pnand %p273_p0, %p267_p11 }
  0x21   :  { %277 = shalt.err (!%p274_p1)
}
  0x22   :  { %23 = dma.hbm_to_vmem [thread:$0]  %s429_s0, 256, %s359_s18, [#allocation3], %s330_s27, %s330_s27, %s331_s28  }
  0x23   :  { %s332_s14 = smov [#allocation7]   ;;  %s278_s19 = scalar_lea.hbm %s432_s3, 256 }
  0x24   :  { %s43_s15 = sshll.u32 %s332_s14, 4  ;;  %p279_p2 = scmp.ne.s32.totalorder %s432_s3, %s278_s19  ;;  %s44_s15 = int_to_ptr.vmem [resolvable:$true] %s43_s15 }
  0x25   :  { %p282_p3 = scmp.lt.u32.totalorder %s278_s19, %s432_s3 }
  0x27   :  { %p284_p4 = pnand %p282_p3, %p279_p2 }
  0x29   :  { %287 = shalt.err (!%p284_p4)
}
  0x2a   :  { %s288_s24 = scalar_lea.vmem %s44_s15, 256  ;;  %p293_p6 = scmp.lt.s32.totalorder %s44_s15, %s44_s15 }
  0x2b   :  { %p289_p5 = scmp.ne.s32.totalorder %s44_s15, %s288_s24  ;;  %p294_p7 = scmp.lt.s32.totalorder %s288_s24, %s288_s24 }
  0x2d   :  { %p295_p8 = por %p294_p7, %p293_p6 }
  0x2f   :  { %p296_p9 = pnand %p295_p8, %p289_p5 }
  0x31   :  { %299 = shalt.err (!%p296_p9)
}
  0x32   :  { %49 = dma.hbm_to_vmem [thread:$0]  %s432_s3, 256, %s44_s15, [#allocation6], %s330_s27, %s330_s27, %s331_s28  }
  0x33   :  { %322 = dma.done.wait [#allocation3], 256  }
  0x34   :  { %323 = vsyncadd [#allocation3], 4294967040 }
  0x35   :  { %324 = dma.done.wait [#allocation6], 768  }
  0x36   :  { %325 = vsyncadd [#allocation6], 4294966528  ;;  %vm72_vm0 = vcmask 261120   ;;  %v61_v0 = vld [vmem:[#allocation5] sm:$0xff]  ;;  %v62_v1 = vld [vmem:[#allocation5 + $0x8] sm:$0xff]  ;;  %s333_s26 = smov [#allocation8]  }
  0x37   :  { %v63_v2 = vld [vmem:[#allocation5 + $0x10] sm:$0xff]  ;;  %v212_v3 = vpack.c.bf16 %v62_v1, %v61_v0  ;;  %v64_v4 = vld [vmem:[#allocation5 + $0x18] sm:$0xff]  ;;  %v167_v19 = vld [vmem:[#allocation7 + $0x8] sm:$0xff]  ;;  %s177_s29 = sshll.u32 %s333_s26, 4  ;;  %s178_s29 = int_to_ptr.vmem [resolvable:$true] %s177_s29 }
  0x38   :  { %v59_v5 = vld [vmem:[#allocation2] sm:$0xff]  ;;  %v216_v6 = vpack.c.bf16 %v64_v4, %v63_v2  ;;  %v60_v7 = vld [vmem:[#allocation2 + $0x8] sm:$0xff]  ;;  %v166_v20 = vld [vmem:[#allocation7] sm:$0xff]  ;;  %p305_p11 = scmp.lt.s32.totalorder %s178_s29, %s178_s29 }
  0x39   :  { %209 = vmatprep.mubr.msk.f32.mxu0 %vm72_vm0, %v59_v5  ;;  %213 = vmatprep.subr.bf16.mxu0 %v212_v3  ;;  %v190_v8 = vld [vmem:[%s431_s2] ss:$0 sm:$0xff]  ;;  %s300_s2 = scalar_lea.vmem %s178_s29, 256 }
  0x3a   :  { %215 = vmatpush3.bf16.msra.mxu0 %v212_v3  ;;  %p301_p10 = scmp.ne.s32.totalorder %s178_s29, %s300_s2  ;;  %p306_p12 = scmp.lt.s32.totalorder %s300_s2, %s300_s2 }
  0x3b   :  { %217 = vmatprep.subr.bf16.mxu0 %v216_v6 }
  0x3c   :  { %p307_p13 = por %p306_p12, %p305_p11 }
  0x3e   :  { %219 = vmatpush3.bf16.msra.mxu0 %v216_v6  ;;  %p308_p0 = pnand %p307_p13, %p301_p10 }
  0x41   :  { %210 = vmatmul.mubr.msk.f32.vlgmr.msra.gmra.mrb[0].mxu0 %vm72_vm0, %v60_v7 }
 0x114   :  { %v211_v9 = vpop.f32.mrb[0].mxu0 }
 0x115   :  { %v151_v10 = vadd.f32 %v211_v9, %v190_v8  ;;  %v145_v11 = vpop.f32.mrb[1].mxu0 }
 0x116   :  { %v146_v12 = vadd.f32 %v190_v8, %v145_v11 }
 0x117   :  { %v194_v13 = vmul.f32 -1.442695, %v151_v10 }
 0x118   :  { %v193_v14 = vmul.f32 -1.442695, %v146_v12 }
 0x119   :  { %226 = vpow2.f32 %v194_v13 }
 0x11a   :  { %228 = vpow2.f32 %v193_v14 }
 0x123   :  { %v227_v15 = vpop.eup %226 }
 0x124   :  { %v229_v16 = vpop.eup %228  ;;  %v161_v17 = vadd.f32 1.0, %v227_v15 }
 0x125   :  { %v160_v18 = vadd.f32 1.0, %v229_v16 }
 0x126   :  { %230 = vrcp.f32 %v161_v17 }
 0x127   :  { %232 = vrcp.f32 %v160_v18 }
 0x130   :  { %v231_v21 = vpop.eup %230 }
 0x131   :  { %v233_v22 = vpop.eup %232  ;;  %v169_v23 = vmul.f32 %v231_v21, %v167_v19 }
 0x132   :  { %v168_v24 = vmul.f32 %v233_v22, %v166_v20 }
 0x133   :  { %171 = vst [vmem:[#allocation8 + $0x8] sm:$0xff] %v169_v23 }
 0x134   :  { %170 = vst [vmem:[#allocation8] sm:$0xff] %v168_v24 }
 0x135   :  { %311 = shalt.err (!%p308_p0)
}
 0x136   :  { %s312_s6 = scalar_lea.hbm %s433_s4, 256 }
 0x137   :  { %p313_p1 = scmp.ne.s32.totalorder %s433_s4, %s312_s6  ;;  %p316_p2 = scmp.lt.u32.totalorder %s312_s6, %s433_s4 }
 0x139   :  { %p318_p3 = pnand %p316_p2, %p313_p1 }
 0x13b   :  { %321 = shalt.err (!%p318_p3)
}
 0x13c   :  { %183 = dma.vmem_to_hbm [thread:$0]  %s178_s29, 256, %s433_s4, [#allocation4], %s330_s27, %s330_s27, %s331_s28  }
 0x13d   :  { %326 = dma.done.wait [#allocation4], 256  }
 0x13e   :  { %327 = vsyncadd [#allocation4], 4294967040 }
 0x13f   :  { %187 = vsyncpa [#allocation3], 1 }
 0x140   :  { %188 = vsyncpa [#allocation6], 1 }
 0x141   :  { %189 = vsyncpa [#allocation4], 1 }

</bundles_post_ra>
